<compile_context>
chip_gen: v7x
topology: tpu7x:2x2x1
jax: 0.10.0
libtpu: 0.0.40
codegen_flags: <defaults>
</compile_context>

<pallas_src>
import functools

import jax
import jax.numpy as jnp
from jax.experimental import pallas as pl
from jax.experimental.pallas import tpu as pltpu


def _round_up(x, m):
    return (x + m - 1) // m * m


def _conv_matmul_kernel(p_ref, w_ref, b_ref, o_ref):
    # p_ref: (tm, K_pad)        patches tile (f32 or bf16)
    # w_ref: (K_pad, tn)        reshaped conv weight tile (f32 or bf16)
    # b_ref: (1, tn)            bias tile (f32)
    # o_ref: (tm, tn)           output tile (f32)
    acc = jnp.dot(p_ref[...], w_ref[...], preferred_element_type=jnp.float32)
    acc = acc + b_ref[...].astype(jnp.float32)
    o_ref[...] = jnp.maximum(acc, 0.0).astype(o_ref.dtype)


def _im2col(x, kh, kw):
    """x: (B, C, H, W) -> patches (B*OH*OW, C*kh*kw), PyTorch weight-flattening order."""
    B, C, H, W = x.shape
    OH, OW = H - kh + 1, W - kw + 1
    cols = []
    for di in range(kh):
        for dj in range(kw):
            cols.append(x[:, :, di:di + OH, dj:dj + OW])  # (B, C, OH, OW)
    p = jnp.stack(cols, axis=2)                    # (B, C, kh*kw, OH, OW)
    p = p.transpose(0, 3, 4, 1, 2)                 # (B, OH, OW, C, kh*kw)
    return p.reshape(B * OH * OW, C * kh * kw), (B, OH, OW)


@functools.partial(jax.jit, static_argnames=("tm_max", "matmul_dtype"))
def conv_layer_forward(x, weight, bias, *, tm_max=1024, matmul_dtype=None):
    """Forward pass of ConvLayer: relu(conv2d(x, weight, bias, stride=1, pad=0)).

    x:      (B, Cin, H, W)        NCHW, float32
    weight: (Cout, Cin, kh, kw)   PyTorch conv weight layout
    bias:   (Cout,)
    matmul_dtype: optional dtype (e.g. jnp.bfloat16) for the MXU inputs; the
                  accumulation / bias / ReLU stay in float32.
    returns (B, Cout, OH, OW)     NCHW
    """
    Cout, Cin, kh, kw = weight.shape
    patches, (B, OH, OW) = _im2col(x, kh, kw)            # (M, K)
    M, K = patches.shape

    w2 = weight.reshape(Cout, K).T                        # (K, Cout)
    b2 = bias.reshape(1, Cout).astype(jnp.float32)        # (1, Cout)

    if matmul_dtype is not None:
        patches = patches.astype(matmul_dtype)
        w2 = w2.astype(matmul_dtype)

    # --- lane/sublane-aligned padding -------------------------------------
    K_pad = _round_up(K, 128)            # 81 -> 128: unmasked, aligned loads
    Cout_pad = _round_up(Cout, 128)      # keep the output lane dim dense

    # Big M tiles (few grid steps), but keep >= 2 M-tiles when possible so both
    # TensorCores on v7x get a "parallel" tile (single-TC v5e/v6e: harmless).
    if M >= 16:
        tm = min(tm_max, _round_up(pl.cdiv(M, 2), 8))
    else:
        tm = _round_up(max(M, 1), 8)
    tm = max(tm, 8)
    M_pad = _round_up(M, tm)

    patches = jnp.pad(patches, ((0, M_pad - M), (0, K_pad - K)))
    w2 = jnp.pad(w2, ((0, K_pad - K), (0, Cout_pad - Cout)))
    b2 = jnp.pad(b2, ((0, 0), (0, Cout_pad - Cout)))

    tn = min(Cout_pad, 256)              # full MXU column width on v6e/v7x
    grid = (M_pad // tm, Cout_pad // tn)

    in_bytes = patches.dtype.itemsize
    cost = pl.CostEstimate(
        flops=2 * M_pad * K_pad * Cout_pad,
        transcendentals=0,
        bytes_accessed=(M_pad * K_pad * in_bytes          # patches
                        + K_pad * Cout_pad * in_bytes     # weights
                        + Cout_pad * 4                    # bias
                        + M_pad * Cout_pad * 4),          # output (f32)
    )

    out_flat = pl.pallas_call(
        _conv_matmul_kernel,
        out_shape=jax.ShapeDtypeStruct((M_pad, Cout_pad), jnp.float32),
        grid_spec=pltpu.PrefetchScalarGridSpec(
            num_scalar_prefetch=0,
            grid=grid,
            in_specs=[
                pl.BlockSpec((tm, K_pad), lambda i, j: (i, 0)),   # patches: tile rows
                pl.BlockSpec((K_pad, tn), lambda i, j: (0, j)),   # weights
                pl.BlockSpec((1, tn), lambda i, j: (0, j)),       # bias
            ],
            out_specs=pl.BlockSpec((tm, tn), lambda i, j: (i, j)),
        ),
        compiler_params=pltpu.CompilerParams(
            dimension_semantics=("parallel", "parallel"),
            vmem_limit_bytes=32 * 1024 * 1024,   # <= v7x default scoped limit; ample here
        ),
        cost_estimate=cost,
    )(patches, w2, b2)

    # (M, Cout) = (B*OH*OW, Cout) -> (B, Cout, OH, OW) to match PyTorch NCHW.
    out = out_flat[:M, :Cout].reshape(B, OH, OW, Cout).transpose(0, 3, 1, 2)
    return out.astype(x.dtype)


if __name__ == "__main__":
    # Small, deterministic example consistent with ConvLayer defaults
    # (in_channels=1, out_channels=256, kernel_size=9, stride=1, no padding).
    B, Cin, H, W = 2, 1, 16, 16
    Cout, k = 256, 9

    key = jax.random.PRNGKey(0)
    kx, kw_, kb = jax.random.split(key, 3)
    x = jax.random.normal(kx, (B, Cin, H, W), dtype=jnp.float32)
    fan_in = Cin * k * k
    bound = float(1.0 / (fan_in ** 0.5))
    weight = jax.random.uniform(kw_, (Cout, Cin, k, k), jnp.float32, -bound, bound)
    bias = jax.random.uniform(kb, (Cout,), jnp.float32, -bound, bound)

    # f32 MXU-input path.
    out = conv_layer_forward(x, weight, bias)
    out = jax.block_until_ready(out)

    # Reference: XLA conv + bias + ReLU.
    ref = jax.lax.conv_general_dilated(
        x, weight, window_strides=(1, 1), padding="VALID",
        dimension_numbers=("NCHW", "OIHW", "NCHW"),
    ) + bias.reshape(1, Cout, 1, 1)
    ref = jnp.maximum(ref, 0.0)

    assert out.shape == (B, Cout, H - k + 1, W - k + 1), out.shape
    assert jnp.allclose(out, ref, atol=1e-4, rtol=1e-4)

    # bf16 MXU-input fast path (v6e/v7x): f32 accumulate, looser tolerance.
    out_bf16 = jax.block_until_ready(
        conv_layer_forward(x, weight, bias, matmul_dtype=jnp.bfloat16))
    assert out_bf16.shape == out.shape
    assert jnp.allclose(out_bf16, ref, atol=5e-2, rtol=5e-2)

    print("KERNEL_OK")
</pallas_src>

<mosaic_0001>
module attributes {stable_mosaic.version = 11 : i64} {
  func.func @_conv_matmul_kernel(%arg0: i32, %arg1: i32, %arg2: memref<64x128xf32, #tpu.memory_space<vmem>>, %arg3: memref<128x256xf32, #tpu.memory_space<vmem>>, %arg4: memref<1x256xf32, #tpu.memory_space<vmem>>, %arg5: memref<64x256xf32, #tpu.memory_space<vmem>>) attributes {dimension_semantics = [#tpu.dimension_semantics<parallel>, #tpu.dimension_semantics<parallel>], iteration_bounds = array<i64: 2, 1>, scalar_prefetch = 0 : i64, scratch_operands = 0 : i64, tpu.core_type = #tpu.core_type<tc>, window_params = [{transform_indices = @transform_0, window_bounds = array<i64: 64, 128>}, {transform_indices = @transform_1, window_bounds = array<i64: 128, 256>}, {transform_indices = @transform_2, window_bounds = array<i64: 1, 256>}, {transform_indices = @transform_3, window_bounds = array<i64: 64, 256>}]} {
    %c0 = arith.constant 0 : index
    %c0_0 = arith.constant 0 : index
    %0 = vector.load %arg2[%c0, %c0_0] : memref<64x128xf32, #tpu.memory_space<vmem>>, vector<64x128xf32>
    %c0_1 = arith.constant 0 : index
    %c0_2 = arith.constant 0 : index
    %1 = vector.load %arg3[%c0_1, %c0_2] : memref<128x256xf32, #tpu.memory_space<vmem>>, vector<128x256xf32>
    %cst = arith.constant dense<0.000000e+00> : vector<64x256xf32>
    %2 = tpu.matmul %0, %1, %cst {dimension_numbers = #tpu.dot_dimension_numbers<[1], [0], [0], [1], [0, 0, 1, 1], [], []>} : vector<64x128xf32>, vector<128x256xf32>, vector<64x256xf32> -> vector<64x256xf32>
    %c0_3 = arith.constant 0 : index
    %c0_4 = arith.constant 0 : index
    %3 = vector.load %arg4[%c0_3, %c0_4] : memref<1x256xf32, #tpu.memory_space<vmem>>, vector<1x256xf32>
    %4 = vector.broadcast %3 : vector<1x256xf32> to vector<64x256xf32>
    %5 = arith.addf %2, %4 : vector<64x256xf32>
    %cst_5 = arith.constant 0.000000e+00 : f32
    %6 = vector.broadcast %cst_5 : f32 to vector<64x256xf32>
    %7 = arith.maximumf %5, %6 : vector<64x256xf32>
    %c0_6 = arith.constant 0 : index
    %c0_7 = arith.constant 0 : index
    %8 = vector.load %arg5[%c0_6, %c0_7] : memref<64x256xf32, #tpu.memory_space<vmem>>, vector<64x256xf32>
    tpu.vector_store %arg5[%c0_6, %c0_7], %7 {strides = array<i32>} : memref<64x256xf32, #tpu.memory_space<vmem>>, vector<64x256xf32>,
    return
  }
  func.func @transform_0(%arg0: i32, %arg1: i32) -> (i32, i32) {
    %c0_i32 = arith.constant 0 : i32
    %c0_i32_0 = arith.constant 0 : i32
    return %arg0, %c0_i32 : i32, i32
  }
  func.func @transform_1(%arg0: i32, %arg1: i32) -> (i32, i32) {
    %c0_i32 = arith.constant 0 : i32
    %c0_i32_0 = arith.constant 0 : i32
    return %c0_i32, %arg1 : i32, i32
  }
  func.func @transform_2(%arg0: i32, %arg1: i32) -> (i32, i32) {
    %c0_i32 = arith.constant 0 : i32
    %c0_i32_0 = arith.constant 0 : i32
    return %c0_i32, %arg1 : i32, i32
  }
  func.func @transform_3(%arg0: i32, %arg1: i32) -> (i32, i32) {
    %c0_i32 = arith.constant 0 : i32
    return %arg0, %arg1 : i32, i32
  }
}

</mosaic_0001>

<bundles_post_ra>
// kernel: conv_layer_forward.1
= control target key start
LH: loop header
LB: loop body
LE: loop exit
PB: predicated region body
PF: predicated region fallthrough
CT: control target
= control target key end

     0   :  { %8 = vsyncpa [#allocation3], 0  ;;  %s1014_s0 = inlined_call_operand.vmem [shape: f32[128,128], index: 0, kind: input, shape index: {}]   ;;  %s1015_s1 = inlined_call_operand.vmem [shape: f32[128,256], index: 1, kind: input, shape index: {}]   ;;  %s1016_s2 = inlined_call_operand.vmem [shape: f32[1,256], index: 2, kind: input, shape index: {}]   ;;  %s1017_s3 = inlined_call_operand.hbm [shape: f32[128,256], index: 3, kind: output, shape index: {}]  }
   0x1   :  { %10 = vsyncpa [#allocation3 + $0x1], 0  ;;  %s770_s12 = smov 0   ;;  %s772_s13 = smov 0  }
   0x2   :  { %s774_s14 = smov 0   ;;  %s776_s15 = smov 0  }
   0x3   :  { %s778_s16 = smov 0   ;;  %s780_s17 = smov 0  }
   0x4 LB: > { %s542_s18 = sadd.s32 4294967295, %s744_s17   ;;  %s543_s19 = sadd.s32 4294967294, %s744_s17   ;;  %s744_s17 = sphi %s780_s17, %s16_s17   ;;  %s740_s16 = sphi %s778_s16, %s1024_s16   ;;  %s736_s15 = sphi %s776_s15, %s1023_s15   ;;  %s732_s14 = sphi %s774_s14, %s1022_s14   ;;  %s728_s13 = sphi %s772_s13, %s1021_s13   ;;  %s724_s12 = sphi %s770_s12, %s1020_s12  }
   0x5   : > { %s28_s20 = sadd.s32 1, %s740_s16  ;;  %s115_s21 = sadd.s32 1, %s732_s14 }
   0x6   : > { %p30_p0 = scmp.ge.s32.totalorder %s28_s20, 2  ;;  %p125_p1 = scmp.ne.s32.totalorder %s732_s14, %s728_s13 }
   0x7   : > { %p126_p2 = scmp.eq.s32.totalorder %s542_s18, 1  ;;  %p131_p3 = scmp.ne.s32.totalorder %s728_s13, %s724_s12 }
   0x8   : > { %s1026_s20 = smov (%p30_p0, %s28_s20), 0  ;;  %p132_p5 = scmp.eq.s32.totalorder %s543_s19, 1 }
   0x9   : > { %p810_p4 = por %p126_p2, %p125_p1  ;;  %s110_s23 = ssub.s32 %s740_s16, %s1026_s20 }
   0xa   : > { %p548_p6 = scmp.ge.s32.totalorder %s744_s17, 1  ;;  %p113_p7 = scmp.eq.s32.totalorder %s110_s23, 0 }
   0xb   : > { %p817_p8 = por %p132_p5, %p131_p3  ;;  %p176_p9 = scmp.lt.s32.totalorder %s744_s17, 3 }
   0xc   : > { %s823_s25 = scalar_select %p113_p7, %s732_s14, %s115_s21  }
   0xd   : > { %p177_p10 = pnand %p548_p6, %p176_p9 }
   0xe   : > { %v237_v0 = vld [vmem:[%s1015_s1 + $0x8] sm:$0xff] (!%p177_p10)  ;;  %v239_v1 = vld [vmem:[%s1015_s1 + $0x18] sm:$0xff] (!%p177_p10)  ;;  %v236_v2 = vld [vmem:[%s1015_s1] sm:$0xff] (!%p177_p10)  ;;  %v746_v7 = vmov (!%p177_p10), 0.0   ;;  %s550_s9 = sshll.u32 (!%p177_p10), %s736_s15, 3  ;;  %v270_v57 = vlaneseq (!%p177_p10)  ;;  %s206_s29 = sand.u32 (!%p177_p10), 1, %s728_s13  }
   0xf   : > { %180 = sbr.rel (%p177_p10) target bundleno = 293 (0x125), region = 32  ;;  %v560_v3 = vpack.c.bf16 (!%p177_p10), %v239_v1, %v237_v0  ;;  %v238_v4 = vld [vmem:[%s1015_s1 + $0x10] sm:$0xff] (!%p177_p10)  ;;  %v241_v5 = vld [vmem:[%s1015_s1 + $0x28] sm:$0xff] (!%p177_p10)  ;;  %v243_v6 = vld [vmem:[%s1015_s1 + $0x38] sm:$0xff] (!%p177_p10)  ;;  %344 = vmatprep.mubr.f32.mxu0 (!%p177_p10), %v746_v7  ;;  %368 = vmatprep.mubr.f32.mxu1 (!%p177_p10), %v746_v7  ;;  %p210_p11 = scmp.lt.s32.totalorder (!%p177_p10), %s550_s9, 15 }
  0x10   : > { %v562_v8 = vpack.c.bf16 (!%p177_p10), %v238_v4, %v236_v2  ;;  %v564_v9 = vpack.c.bf16 (!%p177_p10), %v243_v6, %v241_v5  ;;  %v240_v10 = vld [vmem:[%s1015_s1 + $0x20] sm:$0xff] (!%p177_p10)  ;;  %v242_v11 = vld [vmem:[%s1015_s1 + $0x30] sm:$0xff] (!%p177_p10)  ;;  %v245_v12 = vld [vmem:[%s1015_s1 + $0x48] sm:$0xff] (!%p177_p10)  ;;  %v271_v58 = vshrl.u32 (!%p177_p10), %v270_v57, 7  ;;  %s549_s30 = sshll.u32 (!%p177_p10), %s206_s29, 7  ;;  %s559_s5 = sshll.u32 (!%p177_p10), %s736_s15, 11 }
  0x11   : > { %561 = vmatprep.subr.bf16.mxu0 (!%p177_p10), %v560_v3  ;;  %592 = vmatprep.subr.bf16.mxu1 (!%p177_p10), %v560_v3  ;;  %v247_v13 = vld [vmem:[%s1015_s1 + $0x58] sm:$0xff] (!%p177_p10)  ;;  %v566_v14 = vpack.c.bf16 (!%p177_p10), %v242_v11, %v240_v10  ;;  %v244_v16 = vld [vmem:[%s1015_s1 + $0x40] sm:$0xff] (!%p177_p10)  ;;  %v246_v17 = vld [vmem:[%s1015_s1 + $0x50] sm:$0xff] (!%p177_p10)  ;;  %s939_s4 = scalar_lea.vmem (!%p177_p10), [#allocation2], %s549_s30  ;;  %s958_s8 = scalar_lea.hbm (!%p177_p10), %s1017_s3, %s559_s5 }
  0x12   : > { %563 = vmatpush1.bf16.msra.mxu0 (!%p177_p10), %v562_v8  ;;  %600 = vmatpush1.bf16.msra.mxu1 (!%p177_p10), %v562_v8  ;;  %v568_v15 = vpack.c.bf16 (!%p177_p10), %v247_v13, %v245_v12  ;;  %v249_v18 = vld [vmem:[%s1015_s1 + $0x68] sm:$0xff] (!%p177_p10)  ;;  %v251_v19 = vld [vmem:[%s1015_s1 + $0x78] sm:$0xff] (!%p177_p10)  ;;  %v570_v20 = vpack.c.bf16 (!%p177_p10), %v246_v17, %v244_v16  ;;  %v248_v22 = vld [vmem:[%s1015_s1 + $0x60] sm:$0xff] (!%p177_p10)  ;;  %v272_v59 = vsub.s32 (!%p177_p10), 0, %v271_v58  ;;  %v276_v61 = vsub.s32 (!%p177_p10), 1, %v271_v58  ;;  %s442_s6 = sshll.u32 (!%p177_p10), %s939_s4, 4  ;;  %s960_s6 = int_to_ptr.vmem [resolvable:$true] %s442_s6 }
  0x13   : > { %565 = vmatprep.subr.bf16.mxu0 (!%p177_p10), %v564_v9  ;;  %593 = vmatprep.subr.bf16.mxu1 (!%p177_p10), %v564_v9  ;;  %v572_v21 = vpack.c.bf16 (!%p177_p10), %v251_v19, %v249_v18  ;;  %v250_v23 = vld [vmem:[%s1015_s1 + $0x70] sm:$0xff] (!%p177_p10)  ;;  %v253_v24 = vld [vmem:[%s1015_s1 + $0x88] sm:$0xff] (!%p177_p10)  ;;  %v255_v25 = vld [vmem:[%s1015_s1 + $0x98] sm:$0xff] (!%p177_p10)  ;;  %s968_s10 = scalar_lea.sflag (!%p177_p10), [#allocation3], %s206_s29  ;;  %s666_s11 = scalar_lea.vmem (!%p177_p10), %s960_s6, 2048 }
  0x14   : > { %v574_v26 = vpack.c.bf16 (!%p177_p10), %v250_v23, %v248_v22  ;;  %v576_v27 = vpack.c.bf16 (!%p177_p10), %v255_v25, %v253_v24  ;;  %v252_v28 = vld [vmem:[%s1015_s1 + $0x80] sm:$0xff] (!%p177_p10)  ;;  %v254_v29 = vld [vmem:[%s1015_s1 + $0x90] sm:$0xff] (!%p177_p10)  ;;  %v257_v30 = vld [vmem:[%s1015_s1 + $0xa8] sm:$0xff] (!%p177_p10)  ;;  %p667_p12 = scmp.ne.s32.totalorder (!%p177_p10), %s960_s6, %s666_s11  ;;  %s747_s18 = smov (!%p177_p10), [#allocation2]  }
  0x15   : > { %v259_v31 = vld [vmem:[%s1015_s1 + $0xb8] sm:$0xff] (!%p177_p10)  ;;  %v578_v32 = vpack.c.bf16 (!%p177_p10), %v254_v29, %v252_v28  ;;  %v256_v34 = vld [vmem:[%s1015_s1 + $0xa0] sm:$0xff] (!%p177_p10)  ;;  %v258_v35 = vld [vmem:[%s1015_s1 + $0xb0] sm:$0xff] (!%p177_p10)  ;;  %s670_s19 = sshll.u32 (!%p177_p10), %s747_s18, 4  ;;  %s671_s19 = int_to_ptr.vmem [resolvable:$false] %s670_s19 }
  0x16   : > { %567 = vmatpush1.bf16.msra.mxu0 %v566_v14  ;;  %601 = vmatpush1.bf16.msra.mxu1 %v566_v14  ;;  %v580_v33 = vpack.c.bf16 %v259_v31, %v257_v30  ;;  %v261_v36 = vld [vmem:[%s1015_s1 + $0xc8] sm:$0xff]  ;;  %v263_v37 = vld [vmem:[%s1015_s1 + $0xd8] sm:$0xff]  ;;  %v582_v38 = vpack.c.bf16 %v258_v35, %v256_v34  ;;  %v260_v40 = vld [vmem:[%s1015_s1 + $0xc0] sm:$0xff]  ;;  %s1028_s9 = smov (!%p210_p11, %s550_s9), 15  ;;  %p668_p13 = pnand %p667_p12, %p810_p4 }
  0x17   : > { %569 = vmatprep.subr.bf16.mxu0 %v568_v15  ;;  %594 = vmatprep.subr.bf16.mxu1 %v568_v15  ;;  %v584_v39 = vpack.c.bf16 %v263_v37, %v261_v36  ;;  %v262_v41 = vld [vmem:[%s1015_s1 + $0xd0] sm:$0xff]  ;;  %v265_v42 = vld [vmem:[%s1015_s1 + $0xe8] sm:$0xff]  ;;  %v267_v43 = vld [vmem:[%s1015_s1 + $0xf8] sm:$0xff]  ;;  %s551_s21 = sshll.u32 %s1028_s9, 3  ;;  %p673_p1 = scmp.lt.s32.totalorder %s960_s6, %s671_s19 }
  0x18   : > { %v586_v44 = vpack.c.bf16 %v262_v41, %v260_v40  ;;  %v588_v45 = vpack.c.bf16 %v267_v43, %v265_v42  ;;  %v264_v46 = vld [vmem:[%s1015_s1 + $0xe0] sm:$0xff]  ;;  %v266_v47 = vld [vmem:[%s1015_s1 + $0xf0] sm:$0xff]  ;;  %s213_s27 = scalar_lea.vmem %s1014_s0, %s551_s21  ;;  %p669_p0 = pneg %p668_p13 }
  0x19   : > { %v590_v48 = vpack.c.bf16 %v266_v47, %v264_v46  ;;  %v228_v49 = vld [vmem:[%s213_s27] sm:$0xff]  ;;  %v229_v51 = vld [vmem:[%s213_s27 + $0x8] sm:$0xff]  ;;  %v230_v53 = vld [vmem:[%s213_s27 + $0x10] sm:$0xff]  ;;  %s672_s21 = scalar_lea.vmem %s671_s19, 4096 }
  0x1a   : > { %571 = vmatpush1.bf16.msra.mxu0 %v570_v20  ;;  %602 = vmatpush1.bf16.msra.mxu1 %v570_v20  ;;  %v232_v50 = vld [vmem:[%s213_s27 + $0x20] sm:$0xff]  ;;  %v233_v52 = vld [vmem:[%s213_s27 + $0x28] sm:$0xff]  ;;  %v234_v54 = vld [vmem:[%s213_s27 + $0x30] sm:$0xff]  ;;  %p674_p2 = scmp.lt.s32.totalorder %s672_s21, %s666_s11 }
  0x1b   : > { %573 = vmatprep.subr.bf16.mxu0 %v572_v21  ;;  %595 = vmatprep.subr.bf16.mxu1 %v572_v21  ;;  %v231_v55 = vld [vmem:[%s213_s27 + $0x18] sm:$0xff]  ;;  %v268_v60 = vld [vmem:[%s1016_s2] sm:$0x3] }
  0x1c   : > { %v235_v56 = vld [vmem:[%s213_s27 + $0x38] sm:$0xff]  ;;  %v273_v62 = vrot.slane %v268_v60, %v272_v59  ;;  %v277_v63 = vrot.slane %v268_v60, %v276_v61  ;;  %p675_p3 = por %p674_p2, %p673_p1 }
  0x1e   : > { %575 = vmatpush1.bf16.msra.mxu0 %v574_v26  ;;  %603 = vmatpush1.bf16.msra.mxu1 %v574_v26  ;;  %p676_p5 = pnand %p675_p3, %p669_p0 }
  0x1f   : > { %577 = vmatprep.subr.bf16.mxu0 %v576_v27  ;;  %596 = vmatprep.subr.bf16.mxu1 %v576_v27 }
  0x22   : > { %579 = vmatpush1.bf16.msra.mxu0 %v578_v32  ;;  %604 = vmatpush1.bf16.msra.mxu1 %v578_v32 }
  0x23   : > { %581 = vmatprep.subr.bf16.mxu0 %v580_v33  ;;  %597 = vmatprep.subr.bf16.mxu1 %v580_v33 }
  0x26   : > { %583 = vmatpush1.bf16.msra.mxu0 %v582_v38  ;;  %605 = vmatpush1.bf16.msra.mxu1 %v582_v38 }
  0x27   : > { %585 = vmatprep.subr.bf16.mxu0 %v584_v39  ;;  %598 = vmatprep.subr.bf16.mxu1 %v584_v39 }
  0x2a   : > { %587 = vmatpush1.bf16.msra.mxu0 %v586_v44  ;;  %606 = vmatpush1.bf16.msra.mxu1 %v586_v44 }
  0x2b   : > { %589 = vmatprep.subr.bf16.mxu0 %v588_v45  ;;  %599 = vmatprep.subr.bf16.mxu1 %v588_v45 }
  0x2e   : > { %591 = vmatpush1.bf16.msra.mxu0 %v590_v48  ;;  %607 = vmatpush1.bf16.msra.mxu1 %v590_v48 }
  0x31   : > { %345 = vmatmul.mubr.f32.vlgmr.msra.gmra.mrb[0].mxu0 %v228_v49  ;;  %369 = vmatmul.mubr.f32.vlgmr.msra.gmra.mrb[0].mxu1 %v232_v50 }
  0x32   : > { %350 = vmatprep.mubr.f32.mxu0 %v746_v7  ;;  %374 = vmatprep.mubr.f32.mxu1 %v746_v7 }
  0x35   : > { %351 = vmatmul.mubr.f32.gmra.mrb[2].mxu0 %v229_v51  ;;  %375 = vmatmul.mubr.f32.gmra.mrb[2].mxu1 %v233_v52 }
  0x36   : > { %356 = vmatprep.mubr.f32.mxu0 %v746_v7  ;;  %380 = vmatprep.mubr.f32.mxu1 %v746_v7 }
  0x39   : > { %357 = vmatmul.mubr.f32.gmra.mrb[4].mxu0 %v230_v53  ;;  %381 = vmatmul.mubr.f32.gmra.mrb[4].mxu1 %v234_v54 }
  0x3a   : > { %362 = vmatprep.mubr.f32.mxu0 %v746_v7  ;;  %386 = vmatprep.mubr.f32.mxu1 %v746_v7 }
  0x3d   : > { %363 = vmatmul.mubr.f32.gmra.mrb[6].mxu0 %v231_v55  ;;  %387 = vmatmul.mubr.f32.gmra.mrb[6].mxu1 %v235_v56 }
 0x104   : > { %v346_v0 = vpop.f32.mrb[0].mxu0  ;;  %v370_v1 = vpop.f32.mrb[0].mxu1 }
 0x105   : > { %v347_v2 = vadd.f32 %v346_v0, %v273_v62  ;;  %v371_v3 = vadd.f32 %v370_v1, %v273_v62  ;;  %v348_v4 = vpop.f32.mrb[1].mxu0  ;;  %v372_v5 = vpop.f32.mrb[1].mxu1 }
 0x106   : > { %v349_v6 = vadd.f32 %v348_v4, %v277_v63  ;;  %v373_v7 = vadd.f32 %v372_v5, %v277_v63 }
 0x107   : > { %v393_v8 = vmax.f32 %v347_v2, 0.0  ;;  %v401_v9 = vmax.f32 %v371_v3, 0.0 }
 0x108   : > { %v394_v10 = vmax.f32 %v349_v6, 0.0  ;;  %v402_v11 = vmax.f32 %v373_v7, 0.0  ;;  %v352_v12 = vpop.f32.mrb[2].mxu0  ;;  %v376_v13 = vpop.f32.mrb[2].mxu1 }
 0x109   : > { %409 = vst [vmem:[%s939_s4] sm:$0xff] %v393_v8  ;;  %417 = vst [vmem:[%s939_s4 + $0x40] sm:$0xff] %v401_v9  ;;  %v353_v14 = vadd.f32 %v352_v12, %v273_v62  ;;  %v377_v15 = vadd.f32 %v376_v13, %v273_v62  ;;  %v354_v16 = vpop.f32.mrb[3].mxu0  ;;  %v378_v17 = vpop.f32.mrb[3].mxu1 }
 0x10a   : > { %410 = vst [vmem:[%s939_s4 + $0x8] sm:$0xff] %v394_v10  ;;  %418 = vst [vmem:[%s939_s4 + $0x48] sm:$0xff] %v402_v11  ;;  %v355_v18 = vadd.f32 %v354_v16, %v277_v63  ;;  %v379_v19 = vadd.f32 %v378_v17, %v277_v63 }
 0x10b   : > { %v395_v20 = vmax.f32 %v353_v14, 0.0  ;;  %v403_v21 = vmax.f32 %v377_v15, 0.0 }
 0x10c   : > { %v396_v22 = vmax.f32 %v355_v18, 0.0  ;;  %v404_v23 = vmax.f32 %v379_v19, 0.0  ;;  %v358_v24 = vpop.f32.mrb[4].mxu0  ;;  %v382_v25 = vpop.f32.mrb[4].mxu1 }
 0x10d   : > { %411 = vst [vmem:[%s939_s4 + $0x10] sm:$0xff] %v395_v20  ;;  %419 = vst [vmem:[%s939_s4 + $0x50] sm:$0xff] %v403_v21  ;;  %v359_v26 = vadd.f32 %v358_v24, %v273_v62  ;;  %v383_v27 = vadd.f32 %v382_v25, %v273_v62  ;;  %v360_v28 = vpop.f32.mrb[5].mxu0  ;;  %v384_v29 = vpop.f32.mrb[5].mxu1 }
 0x10e   : > { %412 = vst [vmem:[%s939_s4 + $0x18] sm:$0xff] %v396_v22  ;;  %420 = vst [vmem:[%s939_s4 + $0x58] sm:$0xff] %v404_v23  ;;  %v361_v30 = vadd.f32 %v360_v28, %v277_v63  ;;  %v385_v31 = vadd.f32 %v384_v29, %v277_v63 }
 0x10f   : > { %v397_v32 = vmax.f32 %v359_v26, 0.0  ;;  %v405_v33 = vmax.f32 %v383_v27, 0.0 }
 0x110   : > { %v398_v34 = vmax.f32 %v361_v30, 0.0  ;;  %v406_v35 = vmax.f32 %v385_v31, 0.0  ;;  %v364_v36 = vpop.f32.mrb[6].mxu0  ;;  %v388_v37 = vpop.f32.mrb[6].mxu1 }
 0x111   : > { %413 = vst [vmem:[%s939_s4 + $0x20] sm:$0xff] %v397_v32  ;;  %421 = vst [vmem:[%s939_s4 + $0x60] sm:$0xff] %v405_v33  ;;  %v365_v38 = vadd.f32 %v364_v36, %v273_v62  ;;  %v389_v39 = vadd.f32 %v388_v37, %v273_v62  ;;  %v366_v40 = vpop.f32.mrb[7].mxu0  ;;  %v390_v41 = vpop.f32.mrb[7].mxu1 }
 0x112   : > { %414 = vst [vmem:[%s939_s4 + $0x28] sm:$0xff] %v398_v34  ;;  %422 = vst [vmem:[%s939_s4 + $0x68] sm:$0xff] %v406_v35  ;;  %v367_v42 = vadd.f32 %v366_v40, %v277_v63  ;;  %v391_v43 = vadd.f32 %v390_v41, %v277_v63 }
 0x113   : > { %v399_v44 = vmax.f32 %v365_v38, 0.0  ;;  %v407_v45 = vmax.f32 %v389_v39, 0.0 }
 0x114   : > { %v400_v46 = vmax.f32 %v367_v42, 0.0  ;;  %v408_v47 = vmax.f32 %v391_v43, 0.0 }
 0x115   : > { %415 = vst [vmem:[%s939_s4 + $0x30] sm:$0xff] %v399_v44  ;;  %423 = vst [vmem:[%s939_s4 + $0x70] sm:$0xff] %v407_v45 }
 0x116   : > { %416 = vst [vmem:[%s939_s4 + $0x38] sm:$0xff] %v400_v46  ;;  %424 = vst [vmem:[%s939_s4 + $0x78] sm:$0xff] %v408_v47 }
 0x117   : > { %679 = shalt.err (!%p676_p5)
}
 0x118   : > { %s680_s23 = scalar_lea.hbm %s958_s8, 2048  ;;  %s684_s9 = scalar_lea.hbm %s1017_s3, 4096 }
 0x119   : > { %p681_p6 = scmp.ne.s32.totalorder %s958_s8, %s680_s23  ;;  %p685_p10 = scmp.lt.u32.totalorder %s958_s8, %s1017_s3 }
 0x11a   : > { %p686_p11 = scmp.lt.u32.totalorder %s684_s9, %s680_s23  ;;  %p688_p13 = scmp.lt.u32.totalorder %s680_s23, %s958_s8 }
 0x11b   : > { %p682_p7 = pnand %p681_p6, %p810_p4 }
 0x11c   : > { %p687_p12 = por %p686_p11, %p685_p10 }
 0x11d   : > { %p683_p9 = pneg %p682_p7 }
 0x11e   : > { %p689_p0 = por %p688_p13, %p687_p12 }
 0x120   : > { %p690_p1 = pnand %p689_p0, %p683_p9 }
 0x122   : > { %693 = shalt.err (!%p690_p1)
}
 0x123   : > { %s748_s30 = smov 256   ;;  %s749_s4 = smov 16  }
 0x124   : > { %608 = dma.vmem_to_hbm [thread:$0]  (%p810_p4), %s960_s6, 2048, %s958_s8, %s968_s10, %s748_s30, %s748_s30, %s749_s4  }
 0x125 PF: > { %p614_p2 = scmp.ge.s32.totalorder %s744_s17, 2  ;;  %s457_s5 = sand.u32 1, %s724_s12  }
 0x126   : > { %s458_s15 = scalar_lea.sflag [#allocation3], %s457_s5 }
 0x127   : > { %p611_p3 = pnand %p614_p2, %p817_p8 }
 0x129   : > { %719 = dma.done.wait (!%p611_p3), %s458_s15, 2048  }
 0x12a   : > { %721 = vsyncadd (!%p611_p3), %s458_s15, 4294965248  ;;  %s16_s17 = sadd.s32 1, %s744_s17   ;;  %s1020_s12 = smov %s728_s13 }
 0x12b   : > { %p13_p5 = scmp.ge.s32.totalorder %s16_s17, 4   ;;  %s1021_s13 = smov %s732_s14 }
 0x12c   : > { %s1022_s14 = smov %s823_s25  ;;  %s1023_s15 = smov %s740_s16 }
 0x12d   : > { %s1024_s16 = smov %s1026_s20  ;;  %15 = sbr.rel (!%p13_p5) target bundleno = 4 (0x4), region = 73 }
 0x134   :  { %463 = vsyncpa [#allocation3], 1 }
 0x135   :  { %465 = vsyncpa [#allocation3 + $0x1], 1 }

</bundles_post_ra>
